<compile_context>
chip_gen: v7x
topology: tpu7x:2x2x1
jax: 0.10.0
libtpu: 0.0.40
codegen_flags: <defaults>
</compile_context>

<pallas_src>
import jax
import jax.numpy as jnp
from jax.experimental import pallas as pl
from jax.experimental.pallas import tpu as pltpu


def _make_kernel(b_total, tb, c_dim, tiles_per_core, inv_scale):
    """b_total/tb/c_dim/tiles_per_core: Python ints; inv_scale: Python float."""

    def kernel(yhat_ref, y_ref, out_ref, acc_ref):
        core = pl.program_id(0)                    # "parallel" axis (TensorCore)
        i = pl.program_id(1)                       # "arbitrary" batch-tile axis
        tile = core * tiles_per_core + i           # logical batch-tile index

        # Upcast AFTER the load so HBM traffic stays in the input dtype (bf16 ok).
        x = yhat_ref[...].astype(jnp.float32)      # (TB, C)
        labels = y_ref[...]                        # (TB, 1) int32

        # ---- full-tile work (VPU + one EUP exp + XLU reduces) --------------
        m = jnp.max(x, axis=1, keepdims=True)                       # (TB, 1)
        xm = jnp.maximum(x - m, -80.0)             # clamp: -inf logits stay finite
        e = jnp.exp(xm)                            # only full-tile transcendental
        t = e * xm

        col = jax.lax.broadcasted_iota(jnp.int32, (tb, c_dim), 1)
        is_true = col == labels                                      # (TB, C)

        sum_e = jnp.sum(e, axis=1, keepdims=True)                    # (TB, 1)
        sum_t = jnp.sum(t, axis=1, keepdims=True)                    # (TB, 1)
        e_true = jnp.sum(jnp.where(is_true, e, 0.0), axis=1, keepdims=True)

        # ---- per-row (TB,1) math --------------------------------------------
        # probs = e/sum_e ; Yg = e_true/sum_e ; Yg_ = 1 - Yg + 1e-7
        # Px = probs/Yg_ ; log Px = xm - log(sum_e*Yg_)
        # sum_{c!=y} Px*logPx = [sum_t - t_true - L*(sum_e - e_true)]/(sum_e*Yg_)
        # where t_true = e_true*xm_true = e_true*log(e_true), L = log(sum_e*Yg_).
        t_true = e_true * jnp.log(e_true)
        yg_ = 1.0 - e_true / sum_e + 1e-07
        denom = sum_e * yg_
        log_denom = jnp.log(denom)
        row = (sum_t - t_true - log_denom * (sum_e - e_true)) / denom  # (TB, 1)

        # Rows past the end of the batch (ragged last tile or a clamped
        # duplicate tile) are zeroed; jnp.where also discards any NaN/Inf
        # produced from the unspecified padded rows.
        r = jax.lax.broadcasted_iota(jnp.int32, (tb, 1), 0)
        row = jnp.where(tile * tb + r < b_total, row, 0.0)

        # ---- per-core running scalar sum, scaled output ---------------------
        tile_sum = jnp.sum(row)
        prev = jnp.where(i == 0, 0.0, acc_ref[0])  # reset at the first tile of this core
        total = prev + tile_sum
        acc_ref[0] = total
        # Output block for this core is resident across the inner axis; only the
        # final value is written back.  Lane-dense (1,8,128) => unmasked stores.
        out_ref[...] = jnp.broadcast_to(total * inv_scale, (1, 8, 128))

    return kernel


def _tile_budget():
    """Returns (bytes of logits per tile, vmem_limit_bytes), generation-aware."""
    vmem_bytes = 64 * 1024 * 1024                  # conservative default (v7x-sized)
    try:
        info = pltpu.get_tpu_info()
        vmem_bytes = int(getattr(info, "vmem_capacity_bytes", vmem_bytes))
    except Exception:
        pass
    if vmem_bytes <= 64 * 1024 * 1024:             # v7x: 64 MiB VMEM per TensorCore
        return 4 * 1024 * 1024, 48 * 1024 * 1024
    return 8 * 1024 * 1024, 96 * 1024 * 1024       # v5e / v6e: 128 MiB VMEM


def complement_entropy(yhat: jax.Array, y: jax.Array, *, tile_rows=None) -> jax.Array:
    """yhat: (B, C) float32/bfloat16 logits; y: (B,) int labels. Scalar COT loss."""
    B, C = yhat.shape
    itemsize = jnp.dtype(yhat.dtype).itemsize
    budget, vmem_limit = _tile_budget()

    # Batch tile: ~4-8 MiB of logits (generation-dependent), multiple of 8 rows,
    # capped so the (TB,1) label block stays small.
    if tile_rows is None:
        tile_rows = max(8, (budget // (C * itemsize)) // 8 * 8)
    TB = int(min(int(tile_rows), 4096))
    TB = max(8, TB - TB % 8)
    if TB >= B:
        TB = int(B)                                # one full-batch tile (full-dim block)
    n_tiles = -(-B // TB)                          # cdiv

    num_cores = 2 if n_tiles > 1 else 1            # v7x dual-TC split; harmless on 1-TC chips
    tpc = -(-n_tiles // num_cores)                 # tiles per core

    def x_map(c, i):
        # Clamp so a core's trailing (fully masked) tile never indexes past the
        # array; the in-kernel row mask uses the *logical* tile index.
        return (jnp.minimum(c * tpc + i, n_tiles - 1), 0)

    y_col = y.astype(jnp.int32).reshape(B, 1)
    kernel = _make_kernel(B, TB, C, tpc, 1.0 / (float(B) * float(C)))

    out = pl.pallas_call(
        kernel,
        out_shape=jax.ShapeDtypeStruct((num_cores, 8, 128), jnp.float32),
        grid=(num_cores, tpc),
        in_specs=[
            pl.BlockSpec((TB, C), x_map),          # full-C block: no class padding/pad copy
            pl.BlockSpec((TB, 1), x_map),
        ],
        out_specs=pl.BlockSpec((1, 8, 128), lambda c, i: (c, 0, 0)),
        scratch_shapes=[pltpu.SMEM((1,), jnp.float32)],
        compiler_params=pltpu.CompilerParams(
            dimension_semantics=("parallel", "arbitrary"),
            vmem_limit_bytes=vmem_limit,
        ),
        cost_estimate=pl.CostEstimate(
            flops=int(14 * B * C),
            transcendentals=int(B * C),
            bytes_accessed=int(B * C * itemsize + B * 4 + num_cores * 8 * 128 * 4),
        ),
    )(yhat, y_col)
    # One scaled partial per TensorCore; sum them.
    return jnp.sum(out[:, 0, 0])


def _reference(yhat, y):
    # Pure-JAX reference mirroring the PyTorch module.
    probs = jax.nn.softmax(yhat.astype(jnp.float32), axis=1)
    B, C = yhat.shape
    yg = jnp.take_along_axis(probs, y.astype(jnp.int32)[:, None], axis=1)
    yg_ = 1.0 - yg + 1e-07
    px = probs / yg_
    px_log = jnp.log(px + 1e-10)
    zerohot = 1.0 - jax.nn.one_hot(y, C, dtype=probs.dtype)
    return jnp.sum(px * px_log * zerohot) / B / C


if __name__ == "__main__":
    key = jax.random.PRNGKey(0)
    k1, k2, k3, k4 = jax.random.split(key, 4)

    # Small shape consistent with the module: batch=8, 32 classes.
    B, C = 8, 32
    yhat = jax.random.normal(k1, (B, C), dtype=jnp.float32)
    y = jax.random.randint(k2, (B,), 0, C, dtype=jnp.int32)
    loss = complement_entropy(yhat, y)
    jax.block_until_ready(loss)
    ref = _reference(yhat, y)
    assert jnp.allclose(loss, ref, rtol=5e-4, atol=1e-5), (loss, ref)

    # Exercise the multi-tile / ragged-batch / dual-core path with a forced small tile.
    B2, C2 = 37, 96
    yhat2 = jax.random.normal(k3, (B2, C2), dtype=jnp.float32)
    y2 = jax.random.randint(k4, (B2,), 0, C2, dtype=jnp.int32)
    loss2 = complement_entropy(yhat2, y2, tile_rows=8)
    jax.block_until_ready(loss2)
    ref2 = _reference(yhat2, y2)
    assert jnp.allclose(loss2, ref2, rtol=5e-4, atol=1e-5), (loss2, ref2)

    print("KERNEL_OK")
</pallas_src>

<mosaic_0001>
module attributes {stable_mosaic.version = 11 : i64} {
  func.func @kernel(%arg0: i32, %arg1: i32, %arg2: memref<8x32xf32, #tpu.memory_space<vmem>>, %arg3: memref<8x1xi32, #tpu.memory_space<vmem>>, %arg4: memref<1x8x128xf32, #tpu.memory_space<vmem>>, %arg5: memref<1xf32, #tpu.memory_space<smem>>) attributes {dimension_semantics = [#tpu.dimension_semantics<parallel>, #tpu.dimension_semantics<arbitrary>], iteration_bounds = array<i64: 1, 1>, scalar_prefetch = 0 : i64, scratch_operands = 1 : i64, tpu.core_type = #tpu.core_type<tc>, window_params = [{transform_indices = @transform_0, window_bounds = array<i64: 8, 32>}, {transform_indices = @transform_1, window_bounds = array<i64: 8, 1>}, {transform_indices = @transform_2, window_bounds = array<i64: 1, 8, 128>}]} {
    %c1_i32 = arith.constant 1 : i32
    %0 = arith.muli %arg0, %c1_i32 : i32
    %1 = arith.addi %0, %arg1 : i32
    %c0 = arith.constant 0 : index
    %c0_0 = arith.constant 0 : index
    %2 = vector.load %arg2[%c0, %c0_0] : memref<8x32xf32, #tpu.memory_space<vmem>>, vector<8x32xf32>
    %c0_1 = arith.constant 0 : index
    %c0_2 = arith.constant 0 : index
    %3 = vector.load %arg3[%c0_1, %c0_2] : memref<8x1xi32, #tpu.memory_space<vmem>>, vector<8x1xi32>
    %cst = arith.constant dense<0xFF800000> : vector<8xf32>
    %4 = vector.multi_reduction <maximumf>, %2, %cst [1] : vector<8x32xf32> to vector<8xf32>
    %5 = vector.shape_cast %4 : vector<8xf32> to vector<8x1xf32>
    %6 = vector.broadcast %5 : vector<8x1xf32> to vector<8x32xf32>
    %7 = arith.subf %2, %6 : vector<8x32xf32>
    %cst_3 = arith.constant -8.000000e+01 : f32
    %8 = vector.broadcast %cst_3 : f32 to vector<8x32xf32>
    %9 = arith.maximumf %7, %8 : vector<8x32xf32>
    %10 = math.exp %9 : vector<8x32xf32>
    %11 = arith.mulf %10, %9 : vector<8x32xf32>
    %12 = tpu.iota {dimensions = array<i32: 1>} : vector<8x32xi32>
    %13 = vector.broadcast %3 : vector<8x1xi32> to vector<8x32xi32>
    %14 = arith.cmpi eq, %12, %13 : vector<8x32xi32>
    %cst_4 = arith.constant dense<0.000000e+00> : vector<8xf32>
    %15 = vector.multi_reduction <add>, %10, %cst_4 [1] : vector<8x32xf32> to vector<8xf32>
    %16 = vector.shape_cast %15 : vector<8xf32> to vector<8x1xf32>
    %cst_5 = arith.constant dense<0.000000e+00> : vector<8xf32>
    %17 = vector.multi_reduction <add>, %11, %cst_5 [1] : vector<8x32xf32> to vector<8xf32>
    %18 = vector.shape_cast %17 : vector<8xf32> to vector<8x1xf32>
    %cst_6 = arith.constant 0.000000e+00 : f32
    %19 = vector.broadcast %cst_6 : f32 to vector<8x32xf32>
    %20 = arith.select %14, %10, %19 : vector<8x32xi1>, vector<8x32xf32>
    %cst_7 = arith.constant dense<0.000000e+00> : vector<8xf32>
    %21 = vector.multi_reduction <add>, %20, %cst_7 [1] : vector<8x32xf32> to vector<8xf32>
    %22 = vector.shape_cast %21 : vector<8xf32> to vector<8x1xf32>
    %23 = math.log %22 : vector<8x1xf32>
    %24 = arith.mulf %22, %23 : vector<8x1xf32>
    %25 = arith.divf %22, %16 : vector<8x1xf32>
    %cst_8 = arith.constant 1.000000e+00 : f32
    %26 = vector.broadcast %cst_8 : f32 to vector<8x1xf32>
    %27 = arith.subf %26, %25 : vector<8x1xf32>
    %cst_9 = arith.constant 1.000000e-07 : f32
    %28 = vector.broadcast %cst_9 : f32 to vector<8x1xf32>
    %29 = arith.addf %27, %28 : vector<8x1xf32>
    %30 = arith.mulf %16, %29 : vector<8x1xf32>
    %31 = math.log %30 : vector<8x1xf32>
    %32 = arith.subf %18, %24 : vector<8x1xf32>
    %33 = arith.subf %16, %22 : vector<8x1xf32>
    %34 = arith.mulf %31, %33 : vector<8x1xf32>
    %35 = arith.subf %32, %34 : vector<8x1xf32>
    %36 = arith.divf %35, %30 : vector<8x1xf32>
    %37 = tpu.iota {dimensions = array<i32: 0>} : vector<8x1xi32>
    %c8_i32 = arith.constant 8 : i32
    %38 = arith.muli %1, %c8_i32 : i32
    %39 = vector.broadcast %38 : i32 to vector<8x1xi32>
    %40 = arith.addi %39, %37 : vector<8x1xi32>
    %c8_i32_10 = arith.constant 8 : i32
    %41 = vector.broadcast %c8_i32_10 : i32 to vector<8x1xi32>
    %42 = arith.cmpi slt, %40, %41 : vector<8x1xi32>
    %cst_11 = arith.constant 0.000000e+00 : f32
    %43 = vector.broadcast %cst_11 : f32 to vector<8x1xf32>
    %44 = arith.select %42, %36, %43 : vector<8x1xi1>, vector<8x1xf32>
    %45 = vector.shape_cast %44 : vector<8x1xf32> to vector<1x8x1xf32>
    %cst_12 = arith.constant dense<0.000000e+00> : vector<1xf32>
    %46 = vector.multi_reduction <add>, %45, %cst_12 [1, 2] : vector<1x8x1xf32> to vector<1xf32>
    %47 = vector.shape_cast %46 : vector<1xf32> to vector<1x1x1xf32>
    %48 = vector.extract %47[0, 0, 0] : f32 from vector<1x1x1xf32>
    %c0_i32 = arith.constant 0 : i32
    %49 = arith.cmpi eq, %arg1, %c0_i32 : i32
    %c0_13 = arith.constant 0 : index
    %50 = memref.load %arg5[%c0_13] : memref<1xf32, #tpu.memory_space<smem>>
    %cst_14 = arith.constant 0.000000e+00 : f32
    %51 = arith.select %49, %cst_14, %50 : f32
    %52 = arith.addf %51, %48 : f32
    %c0_15 = arith.constant 0 : index
    %53 = memref.load %arg5[%c0_15] : memref<1xf32, #tpu.memory_space<smem>>
    memref.store %52, %arg5[%c0_15] : memref<1xf32, #tpu.memory_space<smem>>
    %cst_16 = arith.constant 3.906250e-03 : f32
    %54 = arith.mulf %52, %cst_16 : f32
    %55 = vector.broadcast %54 : f32 to vector<1x8x128xf32>
    %c0_17 = arith.constant 0 : index
    %c0_18 = arith.constant 0 : index
    %c0_19 = arith.constant 0 : index
    %56 = vector.load %arg4[%c0_17, %c0_18, %c0_19] : memref<1x8x128xf32, #tpu.memory_space<vmem>>, vector<1x8x128xf32>
    tpu.vector_store %arg4[%c0_17, %c0_18, %c0_19], %55 {strides = array<i32>} : memref<1x8x128xf32, #tpu.memory_space<vmem>>, vector<1x8x128xf32>,
    return
  }
  func.func @transform_0(%arg0: i32, %arg1: i32) -> (i32, i32) {
    %c1_i32 = arith.constant 1 : i32
    %0 = arith.muli %arg0, %c1_i32 : i32
    %1 = arith.addi %0, %arg1 : i32
    %c0_i32 = arith.constant 0 : i32
    %2 = arith.minsi %1, %c0_i32 : i32
    %c0_i32_0 = arith.constant 0 : i32
    %c0_i32_1 = arith.constant 0 : i32
    return %2, %c0_i32_0 : i32, i32
  }
  func.func @transform_1(%arg0: i32, %arg1: i32) -> (i32, i32) {
    %c1_i32 = arith.constant 1 : i32
    %0 = arith.muli %arg0, %c1_i32 : i32
    %1 = arith.addi %0, %arg1 : i32
    %c0_i32 = arith.constant 0 : i32
    %2 = arith.minsi %1, %c0_i32 : i32
    %c0_i32_0 = arith.constant 0 : i32
    %c0_i32_1 = arith.constant 0 : i32
    return %2, %c0_i32_0 : i32, i32
  }
  func.func @transform_2(%arg0: i32, %arg1: i32) -> (i32, i32, i32) {
    %c0_i32 = arith.constant 0 : i32
    %c0_i32_0 = arith.constant 0 : i32
    %c0_i32_1 = arith.constant 0 : i32
    return %arg0, %c0_i32, %c0_i32_0 : i32, i32, i32
  }
}

</mosaic_0001>

<bundles_post_ra>
// kernel: tpu_custom_call.1
= control target key start
LH: loop header
LB: loop body
LE: loop exit
PB: predicated region body
PF: predicated region fallthrough
CT: control target
= control target key end

     0   :  { %vm69_vm0 = vcmask 261120   ;;  %s241_s0 = inlined_call_operand.vmem [shape: f32[8,32], index: 0, kind: input, shape index: {}]   ;;  %s242_s1 = inlined_call_operand.vmem [shape: s32[8,1], index: 1, kind: input, shape index: {}]   ;;  %s243_s2 = inlined_call_operand.hbm [shape: f32[1,8,128], index: 2, kind: output, shape index: {}]  }
   0x1   :  { %v67_v0 = vld [vmem:[%s241_s0] sm:$0xff] }
   0x2   :  { %7 = vsyncpa [#allocation4], 0  ;;  %v70_v1 = vsel %vm69_vm0, %v67_v0, -inf  ;;  %v202_v2 = vmov 0   ;;  %v68_v3 = vld [vmem:[%s242_s1] sm:$0xff]  ;;  %v78_v8 = vlaneseq  ;;  %vm117_vm2 = vcmask 7168  }
   0x3   :  { %167 = vset.pattern.permute.xlu0 %v202_v2  ;;  %s203_s0 = smov [#allocation3]  }
   0x4   :  { %71 = vmax.xlane.f32.xlu0 %v70_v1  ;;  %v79_v9 = vand.u32 127, %v78_v8  ;;  %s143_s1 = sshll.u32 %s203_s0, 4  ;;  %s144_s1 = int_to_ptr.vmem [resolvable:$true] %s143_s1 }
   0x5   :  { %s178_s15 = scalar_lea.vmem %s144_s1, 128  ;;  %p183_p1 = scmp.lt.s32.totalorder %s144_s1, %s144_s1 }
   0x6   :  { %p179_p0 = scmp.ne.s32.totalorder %s144_s1, %s178_s15  ;;  %p184_p2 = scmp.lt.s32.totalorder %s178_s15, %s178_s15 }
   0x8   :  { %p185_p3 = por %p184_p2, %p183_p1 }
   0xa   :  { %p186_p4 = pnand %p185_p3, %p179_p0 }
  0x1a   :  { %81 = vperm.xlu0 %167, %v68_v3  }
  0x91   :  { %v72_v4 = vpop.xlane.xlu0 %71 }
  0x92   :  { %v73_v5 = vsub.f32 %v67_v0, %v72_v4 }
  0x94   :  { %v74_v6 = vmax.f32 %v73_v5, -80.0 }
  0x96   :  { %v75_v7 = vmul.f32 1.442695, %v74_v6 }
  0x98   :  { %168 = vpow2.f32 %v75_v7 }
  0x99   :  { %v82_v10 = vpop.permute.xlu0 %81 }
  0x9a   :  { %vm83_vm1 = vcmp.eq.s32.totalorder %v79_v9, %v82_v10 }
  0xa2   :  { %v169_v11 = vpop.eup %168 }
  0xa3   :  { %v84_v12 = vsel %vm69_vm0, %v169_v11, 0.0  ;;  %v90_v13 = vsel %vm83_vm1, %v169_v11, 0.0  ;;  %v77_v15 = vmul.f32 %v169_v11, %v74_v6 }
  0xa4   :  { %85 = vadd.xlane.f32.xlu1 %v84_v12  ;;  %v91_v14 = vsel %vm69_vm0, %v90_v13, 0.0 }
  0xa5   :  { %v87_v16 = vsel %vm69_vm0, %v77_v15, 0.0 }
  0xa8   :  { %92 = vadd.xlane.f32.xlu1 %v91_v14 }
  0xac   :  { %88 = vadd.xlane.f32.xlu1 %v87_v16 }
 0x131   :  { %v86_v17 = vpop.xlane.xlu1 %85 }
 0x132   :  { %170 = vrcp.f32 %v86_v17 }
 0x135   :  { %v93_v18 = vpop.xlane.xlu1 %92 }
 0x136   :  { %172 = vlog2.f32 %v93_v18  ;;  %v105_v28 = vsub.f32 %v86_v17, %v93_v18 }
 0x139   :  { %v89_v30 = vpop.xlane.xlu1 %88 }
 0x13c   :  { %v171_v19 = vpop.eup %170 }
 0x13d   :  { %v98_v20 = vmul.f32 %v171_v19, %v93_v18 }
 0x13f   :  { %v99_v21 = vsub.f32 1.0, %v98_v20 }
 0x140   :  { %v173_v24 = vpop.eup %172 }
 0x141   :  { %v100_v22 = vadd.f32 1e-07, %v99_v21  ;;  %v95_v25 = vmul.f32 0.6931472, %v173_v24 }
 0x143   :  { %v101_v23 = vmul.f32 %v100_v22, %v86_v17  ;;  %v96_v26 = vmul.f32 %v95_v25, %v93_v18 }
 0x145   :  { %174 = vlog2.f32 %v101_v23  ;;  %v104_v32 = vsub.f32 %v89_v30, %v96_v26 }
 0x146   :  { %176 = vrcp.f32 %v101_v23 }
 0x14f   :  { %v175_v27 = vpop.eup %174 }
 0x150   :  { %v103_v29 = vmul.f32 0.6931472, %v175_v27  ;;  %v177_v34 = vpop.eup %176 }
 0x152   :  { %v106_v31 = vmul.f32 %v105_v28, %v103_v29 }
 0x154   :  { %v107_v33 = vsub.f32 %v104_v32, %v106_v31 }
 0x156   :  { %v109_v35 = vmul.f32 %v177_v34, %v107_v33 }
 0x158   :  { %v118_v36 = vsel %vm117_vm2, %v109_v35, 0.0 }
 0x159   :  { %119 = vadd.xlane.f32.xlu1 %v118_v36 }
 0x1e6   :  { %v120_v37 = vpop.xlane.xlu1 %119 }
 0x1e7   :  { %v121_v38 = vrot.slane %v120_v37, 4 }
 0x1e9   :  { %v122_v39 = vadd.f32 %v121_v38, %v120_v37 }
 0x1eb   :  { %v123_v40 = vrot.slane %v122_v39, 2 }
 0x1ed   :  { %v124_v41 = vadd.f32 %v123_v40, %v122_v39 }
 0x1ef   :  { %v125_v42 = vrot.slane %v124_v41, 1 }
 0x1f1   :  { %v126_v43 = vadd.f32 %v125_v42, %v124_v41 }
 0x1f3   :  { %163 = vpush %v126_v43 }
 0x224   :  { %s164_s13 = spop %163 }
 0x225   :  { %s134_s14 = smul.f32 0.00390625, %s164_s13 }
 0x227   :  { %v135_v44 = vstv %s134_s14 }
 0x228   :  { %136 = vst [vmem:[#allocation3] sm:$0xff] %v135_v44 }
 0x229   :  { %189 = shalt.err (!%p186_p4)
}
 0x22a   :  { %s190_s18 = scalar_lea.hbm %s243_s2, 128 }
 0x22b   :  { %p191_p5 = scmp.ne.s32.totalorder %s243_s2, %s190_s18  ;;  %p194_p6 = scmp.lt.u32.totalorder %s190_s18, %s243_s2 }
 0x22d   :  { %p196_p7 = pnand %p194_p6, %p191_p5 }
 0x22f   :  { %199 = shalt.err (!%p196_p7)
}
 0x230   :  { %146 = dma.vmem_to_hbm [thread:$0]  %s144_s1, 128, %s243_s2, [#allocation4]  }
 0x231   :  { %200 = dma.done.wait [#allocation4], 128  }
 0x232   :  { %201 = vsyncadd [#allocation4], 4294967168 }
 0x233   :  { %150 = vsyncpa [#allocation4], 1 }

</bundles_post_ra>
